<compile_context>
chip_gen: v6e
topology: v6e:2x2x1
jax: 0.10.0
libtpu: 0.0.40
codegen_flags: <defaults>
</compile_context>

<pallas_src>
import math

import jax
import jax.numpy as jnp
from jax.experimental import pallas as pl
from jax.experimental.pallas import tpu as pltpu


# ---------------------------------------------------------------------------
# Kernel: one MXU matmul per (batch, spatial-tile) grid step
# ---------------------------------------------------------------------------
def _equal_conv_kernel(patch_ref, w_ref, b_ref, o_ref):
    # patch_ref: (1, Cin*K*K, T)   lane-dense spatial tile of im2col patches
    # w_ref:     (Cout, Cin*K*K)   pre-scaled weight (resident across grid)
    # b_ref:     (Cout, 1)
    # o_ref:     (1, Cout, T)      lane-dense output tile
    acc = jnp.dot(w_ref[...], patch_ref[0],
                  preferred_element_type=jnp.float32)
    o_ref[0] = (acc + b_ref[...]).astype(o_ref.dtype)


def _pick_spatial_tile(n):
    # Largest lane-dense tile that evenly divides the flattened spatial extent.
    for t in (2048, 1024, 512, 256, 128):
        if n % t == 0:
            return t
    return n  # fall back to full extent (still a legal block shape)


# ---------------------------------------------------------------------------
# Module wrapper (parameter setup + layout plumbing + pallas_call glue)
# ---------------------------------------------------------------------------
class EqualConv2dPallas:
    def __init__(self, in_channel, out_channel, kernel_size,
                 stride=1, padding=0, bias=True, key=None):
        if key is None:
            key = jax.random.PRNGKey(0)

        self.in_channel = in_channel
        self.out_channel = out_channel
        self.kernel_size = kernel_size
        self.stride = stride
        self.padding = padding

        # nn.Parameter(torch.randn(out, in, k, k))
        self.weight = jax.random.normal(
            key, (out_channel, in_channel, kernel_size, kernel_size),
            dtype=jnp.float32)
        # scale = sqrt(1) / sqrt(in * k^2)
        self.scale = 1.0 / math.sqrt(in_channel * kernel_size ** 2)
        # nn.Parameter(torch.zeros(out)) if bias else None
        self.bias = jnp.zeros((out_channel,), jnp.float32) if bias else None

    def __call__(self, x):
        B, Cin, H, W = x.shape
        assert Cin == self.in_channel
        Cout, K = self.out_channel, self.kernel_size
        s, p = self.stride, self.padding
        Ho = (H + 2 * p - K) // s + 1
        Wo = (W + 2 * p - K) // s + 1
        N = Ho * Wo

        # ---- wrapper-side layout plumbing (pad + im2col, fused by XLA) ----
        x_pad = jnp.pad(x, ((0, 0), (0, 0), (p, p), (p, p))) if p > 0 else x
        cols = []
        for dy in range(K):
            for dx in range(K):
                cols.append(
                    x_pad[:, :,
                          dy: dy + (Ho - 1) * s + 1: s,
                          dx: dx + (Wo - 1) * s + 1: s])
        # (B, Cin, K*K, Ho, Wo) -> (B, Cin*K*K, Ho*Wo); the (Cin, ky, kx)
        # flattening order matches weight.reshape(Cout, Cin*K*K) (row-major).
        patches = jnp.stack(cols, axis=2).reshape(B, Cin * K * K, N)

        # Fold the equalized-lr scale into the weight once (not per grid step).
        w_flat = (self.weight * self.scale).reshape(Cout, Cin * K * K)
        bias_col = (self.bias if self.bias is not None
                    else jnp.zeros((Cout,), jnp.float32)).reshape(Cout, 1)

        T = _pick_spatial_tile(N)
        grid = (B, N // T)
        ckk = Cin * K * K

        out = pl.pallas_call(
            _equal_conv_kernel,
            grid=grid,
            in_specs=[
                pl.BlockSpec((1, ckk, T), lambda b, t: (b, 0, t)),
                pl.BlockSpec((Cout, ckk), lambda b, t: (0, 0)),
                pl.BlockSpec((Cout, 1), lambda b, t: (0, 0)),
            ],
            out_specs=pl.BlockSpec((1, Cout, T), lambda b, t: (b, 0, t)),
            out_shape=jax.ShapeDtypeStruct((B, Cout, N), jnp.float32),
            compiler_params=pltpu.CompilerParams(
                dimension_semantics=("parallel", "parallel")),
        )(patches, w_flat, bias_col)

        return out.reshape(B, Cout, Ho, Wo)


# ---------------------------------------------------------------------------
# Pure-JAX reference (mirrors F.conv2d(input, weight*scale, bias, ...))
# ---------------------------------------------------------------------------
def _reference(x, m):
    w = m.weight * m.scale
    out = jax.lax.conv_general_dilated(
        x, w,
        window_strides=(m.stride, m.stride),
        padding=[(m.padding, m.padding), (m.padding, m.padding)],
        dimension_numbers=("NCHW", "OIHW", "NCHW"))
    if m.bias is not None:
        out = out + m.bias[None, :, None, None]
    return out


if __name__ == "__main__":
    key = jax.random.PRNGKey(0)
    k_x, k_w, k_b = jax.random.split(key, 3)

    B, Cin, Cout, K, H, W = 2, 4, 8, 3, 16, 16
    x = jax.random.normal(k_x, (B, Cin, H, W), dtype=jnp.float32)

    # Case 1: 'same'-style conv (padding=1) -> lane-dense 16*16=256 output.
    conv = EqualConv2dPallas(Cin, Cout, K, stride=1, padding=1, bias=True, key=k_w)
    # Non-zero bias so the bias-add path is actually exercised.
    conv.bias = 0.1 * jax.random.normal(k_b, (Cout,), dtype=jnp.float32)

    out = jax.block_until_ready(conv(x))
    ref = jax.block_until_ready(_reference(x, conv))
    assert out.shape == (B, Cout, H, W)
    assert jnp.allclose(out, ref, rtol=1e-4, atol=1e-4), \
        f"max abs err {jnp.max(jnp.abs(out - ref))}"

    # Case 2: module defaults-style config (padding=0, stride=2).
    conv2 = EqualConv2dPallas(Cin, Cout, K, stride=2, padding=0, bias=True, key=k_w)
    out2 = jax.block_until_ready(conv2(x))
    ref2 = jax.block_until_ready(_reference(x, conv2))
    assert out2.shape == ref2.shape
    assert jnp.allclose(out2, ref2, rtol=1e-4, atol=1e-4), \
        f"max abs err {jnp.max(jnp.abs(out2 - ref2))}"

    print("KERNEL_OK")
</pallas_src>

<mosaic_0001>
module attributes {stable_mosaic.version = 11 : i64} {
  func.func @_equal_conv_kernel(%arg0: i32, %arg1: i32, %arg2: memref<1x36x256xf32, #tpu.memory_space<vmem>>, %arg3: memref<8x36xf32, #tpu.memory_space<vmem>>, %arg4: memref<8x1xf32, #tpu.memory_space<vmem>>, %arg5: memref<1x8x256xf32, #tpu.memory_space<vmem>>) attributes {dimension_semantics = [#tpu.dimension_semantics<parallel>, #tpu.dimension_semantics<parallel>], iteration_bounds = array<i64: 2, 1>, scalar_prefetch = 0 : i64, scratch_operands = 0 : i64, tpu.core_type = #tpu.core_type<tc>, window_params = [{transform_indices = @transform_0, window_bounds = array<i64: 1, 36, 256>}, {pipeline_mode = #tpu.pipeline_mode<synchronous>, transform_indices = @transform_1, window_bounds = array<i64: 8, 36>}, {pipeline_mode = #tpu.pipeline_mode<synchronous>, transform_indices = @transform_2, window_bounds = array<i64: 8, 1>}, {transform_indices = @transform_3, window_bounds = array<i64: 1, 8, 256>}]} {
    %c0 = arith.constant 0 : index
    %c0_0 = arith.constant 0 : index
    %0 = vector.load %arg3[%c0, %c0_0] : memref<8x36xf32, #tpu.memory_space<vmem>>, vector<8x36xf32>
    %c0_1 = arith.constant 0 : index
    %c0_2 = arith.constant 0 : index
    %c0_3 = arith.constant 0 : index
    %1 = vector.load %arg2[%c0_1, %c0_2, %c0_3] : memref<1x36x256xf32, #tpu.memory_space<vmem>>, vector<1x36x256xf32>
    %2 = vector.shape_cast %1 : vector<1x36x256xf32> to vector<36x256xf32>
    %cst = arith.constant dense<0.000000e+00> : vector<8x256xf32>
    %3 = tpu.matmul %0, %2, %cst {dimension_numbers = #tpu.dot_dimension_numbers<[1], [0], [0], [1], [0, 0, 1, 1], [], []>} : vector<8x36xf32>, vector<36x256xf32>, vector<8x256xf32> -> vector<8x256xf32>
    %c0_4 = arith.constant 0 : index
    %c0_5 = arith.constant 0 : index
    %4 = vector.load %arg4[%c0_4, %c0_5] : memref<8x1xf32, #tpu.memory_space<vmem>>, vector<8x1xf32>
    %5 = vector.broadcast %4 : vector<8x1xf32> to vector<8x256xf32>
    %6 = arith.addf %3, %5 : vector<8x256xf32>
    %c0_6 = arith.constant 0 : index
    %c0_7 = arith.constant 0 : index
    %c0_8 = arith.constant 0 : index
    %7 = vector.load %arg5[%c0_6, %c0_7, %c0_8] : memref<1x8x256xf32, #tpu.memory_space<vmem>>, vector<1x8x256xf32>
    %8 = vector.shape_cast %7 : vector<1x8x256xf32> to vector<8x256xf32>
    %9 = vector.shape_cast %6 : vector<8x256xf32> to vector<1x8x256xf32>
    tpu.vector_store %arg5[%c0_6, %c0_7, %c0_8], %9 {strides = array<i32>} : memref<1x8x256xf32, #tpu.memory_space<vmem>>, vector<1x8x256xf32>,
    return
  }
  func.func @transform_0(%arg0: i32, %arg1: i32) -> (i32, i32, i32) {
    %c0_i32 = arith.constant 0 : i32
    %c0_i32_0 = arith.constant 0 : i32
    return %arg0, %c0_i32, %arg1 : i32, i32, i32
  }
  func.func @transform_1(%arg0: i32, %arg1: i32) -> (i32, i32) {
    %c0_i32 = arith.constant 0 : i32
    %c0_i32_0 = arith.constant 0 : i32
    %c0_i32_1 = arith.constant 0 : i32
    return %c0_i32, %c0_i32_0 : i32, i32
  }
  func.func @transform_2(%arg0: i32, %arg1: i32) -> (i32, i32) {
    %c0_i32 = arith.constant 0 : i32
    %c0_i32_0 = arith.constant 0 : i32
    %c0_i32_1 = arith.constant 0 : i32
    return %c0_i32, %c0_i32_0 : i32, i32
  }
  func.func @transform_3(%arg0: i32, %arg1: i32) -> (i32, i32, i32) {
    %c0_i32 = arith.constant 0 : i32
    %c0_i32_0 = arith.constant 0 : i32
    return %arg0, %c0_i32, %arg1 : i32, i32, i32
  }
}

</mosaic_0001>

<bundles_post_ra>
// kernel: tpu_custom_call.1
= control target key start
LH: loop header
LB: loop body
LE: loop exit
PB: predicated region body
PF: predicated region fallthrough
CT: control target
= control target key end

     0   :  { %8 = vsyncpa [#allocation3], 0  ;;  %s675_s0 = inlined_call_operand.vmem [shape: f32[2,36,256], index: 0, kind: input, shape index: {}]   ;;  %s676_s1 = inlined_call_operand.vmem [shape: f32[8,36], index: 1, kind: input, shape index: {}]   ;;  %s677_s2 = inlined_call_operand.vmem [shape: f32[8,1], index: 2, kind: input, shape index: {}]   ;;  %s678_s3 = inlined_call_operand.hbm [shape: f32[2,8,256], index: 3, kind: output, shape index: {}]  }
   0x1   :  { %10 = vsyncpa [#allocation3 + $0x1], 0  ;;  %s570_s12 = smov 0   ;;  %s572_s13 = smov 0  }
   0x2   :  { %s574_s14 = smov 0   ;;  %s576_s15 = smov 0  }
   0x3   :  { %s578_s16 = smov 0   ;;  %s580_s17 = smov 0  }
   0x4 LB: > { %s394_s18 = sadd.s32 4294967295, %s545_s17   ;;  %s395_s19 = sadd.s32 4294967294, %s545_s17   ;;  %s545_s17 = sphi %s580_s17, %s16_s17   ;;  %s541_s16 = sphi %s578_s16, %s685_s16   ;;  %s537_s15 = sphi %s576_s15, %s684_s15   ;;  %s533_s14 = sphi %s574_s14, %s683_s14   ;;  %s529_s13 = sphi %s572_s13, %s682_s13   ;;  %s525_s12 = sphi %s570_s12, %s681_s12  }
   0x5   : > { %s28_s20 = sadd.s32 1, %s541_s16  ;;  %s107_s21 = sadd.s32 1, %s533_s14 }
   0x6   : > { %p30_p0 = scmp.ge.s32.totalorder %s28_s20, 2  ;;  %p117_p1 = scmp.ne.s32.totalorder %s533_s14, %s529_s13 }
   0x7   : > { %p118_p2 = scmp.eq.s32.totalorder %s394_s18, 1  ;;  %p123_p3 = scmp.ne.s32.totalorder %s529_s13, %s525_s12 }
   0x8   : > { %s687_s20 = smov (%p30_p0, %s28_s20), 0  ;;  %p124_p5 = scmp.eq.s32.totalorder %s395_s19, 1 }
   0x9   : > { %p610_p4 = por %p118_p2, %p117_p1  ;;  %s102_s23 = ssub.s32 %s541_s16, %s687_s20 }
   0xa   : > { %p398_p6 = scmp.ge.s32.totalorder %s545_s17, 1  ;;  %p105_p7 = scmp.eq.s32.totalorder %s102_s23, 0 }
   0xb   : > { %p617_p8 = por %p124_p5, %p123_p3  ;;  %p161_p9 = scmp.lt.s32.totalorder %s545_s17, 3 }
   0xc   : > { %s623_s25 = scalar_select %p105_p7, %s533_s14, %s107_s21  }
   0xd   : > { %p162_p10 = pnand %p398_p6, %p161_p9 }
   0xe   : > { %p190_p11 = scmp.lt.s32.totalorder (!%p162_p10), %s537_s15, 1  ;;  %s186_s8 = sand.u32 (!%p162_p10), 1, %s529_s13  }
   0xf   : > { %165 = sbr.rel (%p162_p10) target bundleno = 246 (0xf6), region = 32  ;;  %s399_s9 = sshll.u32 (!%p162_p10), %s186_s8, 4 }
  0x10   : > { %s409_s10 = sshll.u32 (!%p162_p10), %s537_s15, 8  ;;  %s188_s11 = scalar_lea.vmem (!%p162_p10), [#allocation2], %s399_s9 }
  0x11   : > { %s318_s18 = sshll.u32 (!%p162_p10), %s188_s11, 4  ;;  %s316_s23 = scalar_lea.hbm (!%p162_p10), %s678_s3, %s409_s10  ;;  %s319_s18 = int_to_ptr.vmem [resolvable:$true] %s318_s18 }
  0x12   : > { %s302_s26 = scalar_lea.sflag (!%p162_p10), [#allocation3], %s186_s8  ;;  %s469_s27 = scalar_lea.vmem (!%p162_p10), %s319_s18, 256 }
  0x13   : > { %p470_p12 = scmp.ne.s32.totalorder (!%p162_p10), %s319_s18, %s469_s27 }
  0x14   : > { %v547_v0 = vmov 0.0   ;;  %v548_v1 = vmov 0   ;;  %v211_v2 = vld [vmem:[%s677_s2] sm:$0xff]  ;;  %s191_s28 = scalar_select %p190_p11, %s537_s15, 1  ;;  %vm221_vm0 = vcmask 1043456   ;;  %vm217_vm1 = vcmask 293888  }
  0x15   : > { %292 = vmatprep.mubr.f32.mxu0 %v547_v0  ;;  %468 = vset.pattern.permute.xlu0 %v548_v1  ;;  %v200_v13 = vld [vmem:[%s676_s1] sm:$0xff]  ;;  %p471_p13 = pnand %p470_p12, %p610_p4 }
  0x16   : > { %214 = vperm.xlu0 %468, %v211_v2   ;;  %s410_s29 = smul.u32 80, %s191_s28  ;;  %s549_s28 = smov [#allocation2]  }
  0x17   : > { %p472_p0 = pneg %p471_p13  ;;  %s473_s15 = sshll.u32 %s549_s28, 4  ;;  %s474_s15 = int_to_ptr.vmem [resolvable:$false] %s473_s15 }
  0x18   : > { %s197_s5 = scalar_lea.vmem %s675_s0, %s410_s29  ;;  %s475_s29 = scalar_lea.vmem %s474_s15, 512 }
  0x19   : > { %v210_v3 = vld [vmem:[%s197_s5 + $0x48] sm:$0xf]  ;;  %v209_v4 = vld [vmem:[%s197_s5 + $0x40] sm:$0xf]  ;;  %v208_v5 = vld [vmem:[%s197_s5 + $0x38] sm:$0xff]  ;;  %p476_p1 = scmp.lt.s32.totalorder %s319_s18, %s474_s15  ;;  %p477_p2 = scmp.lt.s32.totalorder %s475_s29, %s469_s27 }
  0x1a   : > { %401 = vmatprep.subr.msk.mxu0 %vm221_vm0, %v210_v3  ;;  %v207_v6 = vld [vmem:[%s197_s5 + $0x30] sm:$0xff]  ;;  %v206_v7 = vld [vmem:[%s197_s5 + $0x28] sm:$0xff]  ;;  %v205_v8 = vld [vmem:[%s197_s5 + $0x20] sm:$0xff] }
  0x1b   : > { %402 = vmatpush1.msk.msra.mxu0 %vm221_vm0, %v209_v4  ;;  %v204_v9 = vld [vmem:[%s197_s5 + $0x18] sm:$0xff]  ;;  %v203_v10 = vld [vmem:[%s197_s5 + $0x10] sm:$0xff]  ;;  %v202_v11 = vld [vmem:[%s197_s5 + $0x8] sm:$0xff]  ;;  %p478_p3 = por %p477_p2, %p476_p1 }
  0x1c   : > { %252 = vmatprep.subr.mxu0 %v208_v5  ;;  %v201_v12 = vld [vmem:[%s197_s5] sm:$0xff] }
  0x1d   : > { %253 = vmatpush1.msra.mxu0 %v207_v6  ;;  %p479_p5 = pnand %p478_p3, %p472_p0 }
  0x1e   : > { %254 = vmatprep.subr.mxu0 %v206_v7 }
  0x1f   : > { %255 = vmatpush1.msra.mxu0 %v205_v8 }
  0x20   : > { %256 = vmatprep.subr.mxu0 %v204_v9 }
  0x21   : > { %257 = vmatpush1.msra.mxu0 %v203_v10 }
  0x22   : > { %258 = vmatprep.subr.mxu0 %v202_v11 }
  0x23   : > { %259 = vmatpush1.msra.mxu0 %v201_v12 }
  0x24   : > { %403 = vmatmul.mubr.msk.f32.vlgmr.msra.gmra.mxu0 %vm217_vm1, %v200_v13 }
  0x91   : > { %v215_v14 = vpop.permute.xlu0 %214 }
  0xe4   : > { %v294_v15 = vpop.f32.mrf.mxu0 }
  0xe5   : > { %v295_v16 = vadd.f32 %v294_v15, %v215_v14 }
  0xe6   : > { %v296_v17 = vpop.f32.mrf.mxu0 }
  0xe7   : > { %299 = vst [vmem:[%s188_s11] sm:$0xff] %v295_v16  ;;  %v297_v18 = vadd.f32 %v296_v17, %v215_v14 }
  0xe9   : > { %300 = vst [vmem:[%s188_s11 + $0x8] sm:$0xff] %v297_v18 }
  0xea   : > { %482 = shalt.err (!%p479_p5)
}
  0xeb   : > { %s483_s30 = scalar_lea.hbm %s316_s23, 256  ;;  %s487_s6 = scalar_lea.hbm %s678_s3, 512 }
  0xec   : > { %p484_p6 = scmp.ne.s32.totalorder %s316_s23, %s483_s30  ;;  %p488_p10 = scmp.lt.s32.totalorder %s316_s23, %s678_s3 }
  0xed   : > { %p489_p11 = scmp.lt.s32.totalorder %s487_s6, %s483_s30 }
  0xee   : > { %p485_p7 = pnand %p484_p6, %p610_p4 }
  0xef   : > { %p490_p12 = por %p489_p11, %p488_p10 }
  0xf0   : > { %p486_p9 = pneg %p485_p7 }
  0xf2   : > { %p491_p13 = pnand %p490_p12, %p486_p9 }
  0xf4   : > { %494 = shalt.err (!%p491_p13)
}
  0xf5   : > { %411 = dma.vmem_to_hbm [thread:$0]  (%p610_p4), %s319_s18, 256, %s316_s23, %s302_s26  }
  0xf6 PF: > { %p417_p0 = scmp.ge.s32.totalorder %s545_s17, 2  ;;  %s330_s9 = sand.u32 1, %s525_s12  }
  0xf7   : > { %s331_s10 = scalar_lea.sflag [#allocation3], %s330_s9 }
  0xf8   : > { %p414_p1 = pnand %p417_p0, %p617_p8 }
  0xfa   : > { %p415_p2 = pneg %p414_p1 }
  0xfc   : > { %520 = dma.done.wait (%p415_p2), %s331_s10, 256  }
  0xfd   : > { %522 = vsyncadd (%p415_p2), %s331_s10, 4294967040  ;;  %s16_s17 = sadd.s32 1, %s545_s17   ;;  %s681_s12 = smov %s529_s13 }
  0xfe   : > { %p13_p3 = scmp.ge.s32.totalorder %s16_s17, 4   ;;  %s682_s13 = smov %s533_s14 }
  0xff   : > { %s683_s14 = smov %s623_s25  ;;  %s684_s15 = smov %s541_s16 }
 0x100   : > { %s685_s16 = smov %s687_s20  ;;  %15 = sbr.rel (!%p13_p3) target bundleno = 4 (0x4), region = 67 }
 0x105   :  { %336 = vsyncpa [#allocation3], 1 }
 0x106   :  { %338 = vsyncpa [#allocation3 + $0x1], 1 }

</bundles_post_ra>
